<compile_context>
chip_gen: v7x
topology: tpu7x:2x2x1
jax: 0.10.0
libtpu: 0.0.40
codegen_flags: <defaults>
</compile_context>

<pallas_src>
import functools

import jax
import jax.numpy as jnp
from jax.experimental import pallas as pl
from jax.experimental.pallas import tpu as pltpu

# Module config (mirrors __init__):
PRECISION = 30
IMSIZE = (16, 136)                 # (h, w)
N = 120 // PRECISION               # number of spatial descriptors (4)
S = IMSIZE[1] - N * PRECISION      # pooling window width along w (16)

_MAX_TILE_BC = 1024                         # multiple of 8
_VMEM_INPUT_BUDGET = 24 * 1024 * 1024       # double-buffered input budget
_VMEM_LIMIT_BYTES = 32 * 1024 * 1024        # safe scoped limit on v5e/v6e/v7x


def _round_up(x, m):
    return ((x + m - 1) // m) * m


def _spatial_maxpool_kernel(x_ref, o_ref, *, starts, win_width, use_sweep):
    # x_ref: [tile_bc, h, wb] block; o_ref: [tile_bc, n] block.
    x = x_ref[...]

    # Single hoisted sublane (h) reduction for the whole block.
    h_max = jnp.max(x, axis=1)                                 # [tile_bc, wb]

    if use_sweep:
        # Joint "shift + max" sweep over the lane axis: after the sweep,
        # r[:, j] == max(h_max[:, j : j + win_width]) for every valid j.
        # log2(win_width) steps instead of n independent tree-reductions.
        r = h_max
        covered = 1
        while covered < win_width:
            step = min(covered, win_width - covered)
            r = jnp.maximum(r[:, : r.shape[1] - step], r[:, step:])
            covered += step
        cols = [r[:, st:st + 1] for st in starts]              # pick window starts
    else:
        # Fallback (non-default): independent per-window lane reductions.
        cols = [jnp.max(h_max[:, st:st + win_width], axis=1, keepdims=True)
                for st in starts]

    o_ref[...] = jnp.concatenate(cols, axis=1).astype(o_ref.dtype)


def spatial_max_pooling(x, *, precision=PRECISION):
    """x: [b, c, h, w] (NCHW) -> [b, c, n]."""
    b, c, h, w = x.shape
    n = 120 // precision                    # module spec hard-codes 120
    s = w - n * precision
    win_width = 2 * (s // 2)                # matches PyTorch centered window
    starts = tuple(i * precision for i in range(n))
    if n < 1 or win_width < 1 or starts[-1] + win_width > w:
        raise ValueError(
            f"Invalid SpatialMaxPooling config: w={w}, precision={precision}, "
            f"n={n}, window={win_width}")

    bc = b * c
    itemsize = jnp.dtype(x.dtype).itemsize
    x2 = x.reshape(bc, h, w)                # free row-major collapse, no transpose

    # Trim the block lane dim to 128 when every used column fits (config-guarded;
    # 128 is a multiple of 128 so it is a legal block width even though w=136).
    max_col = starts[-1] + win_width
    wb = 128 if (w > 128 and max_col <= 128) else w

    # Tile the independent b*c axis. Keep double-buffered blocks inside VMEM and,
    # when bc > 8, force >= 2 blocks so v7x's two TensorCores both get work.
    bytes_per_row = _round_up(h, 8) * _round_up(wb, 128) * itemsize
    vmem_cap = max(8, ((_VMEM_INPUT_BUDGET // (2 * bytes_per_row)) // 8) * 8)
    cap = min(_MAX_TILE_BC, vmem_cap)
    if bc <= 8:
        tile_bc = bc
    else:
        tile_bc = min(cap, _round_up(pl.cdiv(bc, 2), 8))
    grid = (pl.cdiv(bc, tile_bc),)

    kernel = functools.partial(
        _spatial_maxpool_kernel,
        starts=starts,
        win_width=win_width,
        use_sweep=(max_col <= wb),
    )

    cost = pl.CostEstimate(
        flops=bc * n * h * win_width,
        transcendentals=0,
        bytes_accessed=bc * h * wb * itemsize + bc * n * itemsize,
    )

    out = pl.pallas_call(
        kernel,
        out_shape=jax.ShapeDtypeStruct((bc, n), x.dtype),
        grid=grid,
        in_specs=[pl.BlockSpec((tile_bc, h, wb), lambda i: (i, 0, 0))],
        out_specs=pl.BlockSpec((tile_bc, n), lambda i: (i, 0)),
        compiler_params=pltpu.CompilerParams(
            dimension_semantics=("parallel",),        # b*c blocks are independent
            vmem_limit_bytes=_VMEM_LIMIT_BYTES,
        ),
        cost_estimate=cost,
    )(x2)

    return out.reshape(b, c, n)             # free reshape == torch.cat(..., dim=2)


def _reference(x, precision=PRECISION):
    # Pure-JAX transcription of the PyTorch forward (desc_transform = max pool + flatten).
    b, c, h, w = x.shape
    n = 120 // precision
    s = w - n * precision
    start_index = s // 2
    half_width = s // 2
    descs = []
    for i in range(n):
        cs = start_index + i * precision
        win = x[:, :, :, cs - half_width:cs + half_width]
        descs.append(jnp.max(win, axis=(2, 3))[:, :, None])
    return jnp.concatenate(descs, axis=2)


if __name__ == "__main__":
    key = jax.random.PRNGKey(0)
    b, c = 2, 4
    h, w = IMSIZE
    x = jax.random.normal(key, (b, c, h, w), dtype=jnp.float32)

    out = spatial_max_pooling(x)
    out = jax.block_until_ready(out)

    ref = _reference(x)
    assert out.shape == (b, c, N), out.shape
    assert jnp.allclose(out, ref), "Pallas kernel output mismatch vs reference"
    print("KERNEL_OK")
</pallas_src>

<mosaic_0001>
module attributes {stable_mosaic.version = 11 : i64} {
  func.func @_spatial_maxpool_kernel(%arg0: i32, %arg1: memref<8x16x128xf32, #tpu.memory_space<vmem>>, %arg2: memref<8x4xf32, #tpu.memory_space<vmem>>) attributes {dimension_semantics = [#tpu.dimension_semantics<parallel>], iteration_bounds = array<i64: 1>, scalar_prefetch = 0 : i64, scratch_operands = 0 : i64, tpu.core_type = #tpu.core_type<tc>, window_params = [{transform_indices = @transform_0, window_bounds = array<i64: 8, 16, 128>}, {transform_indices = @transform_1, window_bounds = array<i64: 8, 4>}]} {
    %c0 = arith.constant 0 : index
    %c0_0 = arith.constant 0 : index
    %c0_1 = arith.constant 0 : index
    %0 = vector.load %arg1[%c0, %c0_0, %c0_1] : memref<8x16x128xf32, #tpu.memory_space<vmem>>, vector<8x16x128xf32>
    %cst = arith.constant dense<0xFF800000> : vector<8x128xf32>
    %1 = vector.multi_reduction <maximumf>, %0, %cst [1] : vector<8x16x128xf32> to vector<8x128xf32>
    %2 = vector.extract_strided_slice %1 {offsets = [0, 0], sizes = [8, 127], strides = [1, 1]} : vector<8x128xf32> to vector<8x127xf32>
    %3 = vector.extract_strided_slice %1 {offsets = [0, 1], sizes = [8, 127], strides = [1, 1]} : vector<8x128xf32> to vector<8x127xf32>
    %4 = arith.maximumf %2, %3 : vector<8x127xf32>
    %5 = vector.extract_strided_slice %4 {offsets = [0, 0], sizes = [8, 125], strides = [1, 1]} : vector<8x127xf32> to vector<8x125xf32>
    %6 = vector.extract_strided_slice %4 {offsets = [0, 2], sizes = [8, 125], strides = [1, 1]} : vector<8x127xf32> to vector<8x125xf32>
    %7 = arith.maximumf %5, %6 : vector<8x125xf32>
    %8 = vector.extract_strided_slice %7 {offsets = [0, 0], sizes = [8, 121], strides = [1, 1]} : vector<8x125xf32> to vector<8x121xf32>
    %9 = vector.extract_strided_slice %7 {offsets = [0, 4], sizes = [8, 121], strides = [1, 1]} : vector<8x125xf32> to vector<8x121xf32>
    %10 = arith.maximumf %8, %9 : vector<8x121xf32>
    %11 = vector.extract_strided_slice %10 {offsets = [0, 0], sizes = [8, 113], strides = [1, 1]} : vector<8x121xf32> to vector<8x113xf32>
    %12 = vector.extract_strided_slice %10 {offsets = [0, 8], sizes = [8, 113], strides = [1, 1]} : vector<8x121xf32> to vector<8x113xf32>
    %13 = arith.maximumf %11, %12 : vector<8x113xf32>
    %14 = vector.extract_strided_slice %13 {offsets = [0, 0], sizes = [8, 1], strides = [1, 1]} : vector<8x113xf32> to vector<8x1xf32>
    %15 = vector.extract_strided_slice %13 {offsets = [0, 30], sizes = [8, 1], strides = [1, 1]} : vector<8x113xf32> to vector<8x1xf32>
    %16 = vector.extract_strided_slice %13 {offsets = [0, 60], sizes = [8, 1], strides = [1, 1]} : vector<8x113xf32> to vector<8x1xf32>
    %17 = vector.extract_strided_slice %13 {offsets = [0, 90], sizes = [8, 1], strides = [1, 1]} : vector<8x113xf32> to vector<8x1xf32>
    %18 = tpu.concatenate %14, %15, %16, %17 in 1 : vector<8x1xf32>, vector<8x1xf32>, vector<8x1xf32>, vector<8x1xf32> -> vector<8x4xf32>
    %c0_2 = arith.constant 0 : index
    %c0_3 = arith.constant 0 : index
    %19 = vector.load %arg2[%c0_2, %c0_3] : memref<8x4xf32, #tpu.memory_space<vmem>>, vector<8x4xf32>
    tpu.vector_store %arg2[%c0_2, %c0_3], %18 {strides = array<i32>} : memref<8x4xf32, #tpu.memory_space<vmem>>, vector<8x4xf32>,
    return
  }
  func.func @transform_0(%arg0: i32) -> (i32, i32, i32) {
    %c0_i32 = arith.constant 0 : i32
    %c0_i32_0 = arith.constant 0 : i32
    %c0_i32_1 = arith.constant 0 : i32
    return %arg0, %c0_i32, %c0_i32_0 : i32, i32, i32
  }
  func.func @transform_1(%arg0: i32) -> (i32, i32) {
    %c0_i32 = arith.constant 0 : i32
    %c0_i32_0 = arith.constant 0 : i32
    return %arg0, %c0_i32 : i32, i32
  }
}

</mosaic_0001>

<bundles_post_ra>
// kernel: tpu_custom_call.1
= control target key start
LH: loop header
LB: loop body
LE: loop exit
PB: predicated region body
PF: predicated region fallthrough
CT: control target
= control target key end

     0   :  { %6 = vsyncpa [#allocation3], 0  ;;  %s341_s6 = smov [#allocation2]   ;;  %s380_s0 = inlined_call_operand.hbm [shape: f32[8,16,136], index: 0, kind: input, shape index: {}]   ;;  %s381_s1 = inlined_call_operand.vmem [shape: f32[8,4], index: 1, kind: output, shape index: {}]  }
   0x1   :  { %s12_s7 = sshll.u32 %s341_s6, 4  ;;  %s317_s10 = scalar_lea.hbm %s380_s0, 2048  ;;  %s13_s7 = int_to_ptr.vmem [resolvable:$true] %s12_s7 }
   0x2   :  { %p318_p0 = scmp.ne.s32.totalorder %s380_s0, %s317_s10  ;;  %s319_s15 = scalar_lea.hbm %s380_s0, 4096 }
   0x3   :  { %p320_p1 = scmp.lt.u32.totalorder %s319_s15, %s317_s10  ;;  %p321_p2 = scmp.lt.u32.totalorder %s317_s10, %s380_s0 }
   0x5   :  { %p322_p3 = por %p321_p2, %p320_p1 }
   0x7   :  { %p323_p4 = pnand %p322_p3, %p318_p0 }
   0x9   :  { %326 = shalt.err (!%p323_p4)
}
   0xa   :  { %s327_s18 = scalar_lea.vmem %s13_s7, 2048  ;;  %p332_p6 = scmp.lt.s32.totalorder %s13_s7, %s13_s7 }
   0xb   :  { %p328_p5 = scmp.ne.s32.totalorder %s13_s7, %s327_s18  ;;  %p333_p7 = scmp.lt.s32.totalorder %s327_s18, %s327_s18 }
   0xd   :  { %p334_p8 = por %p333_p7, %p332_p6 }
   0xf   :  { %p335_p9 = pnand %p334_p8, %p328_p5 }
  0x11   :  { %338 = shalt.err (!%p335_p9)
}
  0x12   :  { %s342_s19 = smov 256   ;;  %s343_s20 = smov 128  }
  0x13   :  { %s344_s21 = smov 8  }
  0x14   :  { %18 = dma.hbm_to_vmem [thread:$0]  %s380_s0, 2048, %s13_s7, [#allocation3], %s342_s19, %s343_s20, %s344_s21  }
  0x15   :  { %339 = dma.done.wait [#allocation3], 2048  }
  0x16   :  { %340 = vsyncadd [#allocation3], 4294965248  ;;  %v24_v0 = vld [vmem:[#allocation2 + $0x10] sm:$0xff]  ;;  %v25_v1 = vld [vmem:[#allocation2 + $0x18] sm:$0xff]  ;;  %s345_s0 = smov 127   ;;  %s346_s24 = smov 126  }
  0x17   :  { %v26_v2 = vld [vmem:[#allocation2 + $0x20] sm:$0xff]  ;;  %v45_v3 = vmax.f32 %v24_v0, %v25_v1  ;;  %v27_v4 = vld [vmem:[#allocation2 + $0x28] sm:$0xff]  ;;  %v28_v11 = vld [vmem:[#allocation2 + $0x30] sm:$0xff]  ;;  %s347_s25 = smov 124   ;;  %s348_s26 = smov 120   ;;  %vm263_vm0 = vcmask 1041409  }
  0x18   :  { %v22_v5 = vld [vmem:[#allocation2] sm:$0xff]  ;;  %v23_v6 = vld [vmem:[#allocation2 + $0x8] sm:$0xff]  ;;  %v52_v7 = vmax.f32 %v26_v2, %v27_v4  ;;  %v29_v14 = vld [vmem:[#allocation2 + $0x38] sm:$0xff]  ;;  %vm266_vm1 = vcmask 1042434   ;;  %vm269_vm2 = vcmask 1043459   ;;  %vm272_vm3 = vcmask 1044484  }
  0x19   :  { %v38_v8 = vmax.f32 %v22_v5, %v23_v6  ;;  %v30_v9 = vld [vmem:[#allocation2 + $0x40] sm:$0xff]  ;;  %v31_v10 = vld [vmem:[#allocation2 + $0x48] sm:$0xff]  ;;  %v46_v12 = vrot.slane %v45_v3, 4  ;;  %v59_v19 = vmax.f32 %v28_v11, %v29_v14  ;;  %v32_v21 = vld [vmem:[#allocation2 + $0x50] sm:$0xff]  ;;  %vm275_vm4 = vcmask 1045509   ;;  %s349_s27 = smov 70  }
  0x1a   :  { %v66_v13 = vmax.f32 %v30_v9, %v31_v10  ;;  %v34_v15 = vld [vmem:[#allocation2 + $0x60] sm:$0xff]  ;;  %v35_v16 = vld [vmem:[#allocation2 + $0x68] sm:$0xff]  ;;  %v53_v17 = vrot.slane %v52_v7, 4  ;;  %v33_v22 = vld [vmem:[#allocation2 + $0x58] sm:$0xff]  ;;  %vm278_vm5 = vcmask 1046534   ;;  %vm281_vm6 = vcmask 1047559  }
  0x1b   :  { %v39_v18 = vrot.slane %v38_v8, 4  ;;  %v80_v20 = vmax.f32 %v34_v15, %v35_v16  ;;  %v36_v23 = vld [vmem:[#allocation2 + $0x70] sm:$0xff]  ;;  %v47_v24 = vmax.f32 %v45_v3, %v46_v12  ;;  %v73_v26 = vmax.f32 %v32_v21, %v33_v22  ;;  %v37_v27 = vld [vmem:[#allocation2 + $0x78] sm:$0xff]  ;;  %s350_s28 = smov 99   ;;  %s351_s29 = smov 41  }
  0x1c   :  { %v67_v25 = vrot.slane %v66_v13, 4  ;;  %v54_v28 = vmax.f32 %v52_v7, %v53_v17  ;;  %v60_v30 = vrot.slane %v59_v19, 4  ;;  %v87_v35 = vmax.f32 %v36_v23, %v37_v27 }
  0x1d   :  { %v40_v29 = vmax.f32 %v38_v8, %v39_v18  ;;  %v81_v31 = vrot.slane %v80_v20, 4  ;;  %v48_v32 = vrot.slane %v47_v24, 2  ;;  %v74_v34 = vrot.slane %v73_v26, 4 }
  0x1e   :  { %v68_v33 = vmax.f32 %v66_v13, %v67_v25  ;;  %v55_v36 = vrot.slane %v54_v28, 2  ;;  %v61_v38 = vmax.f32 %v59_v19, %v60_v30  ;;  %v88_v43 = vrot.slane %v87_v35, 4 }
  0x1f   :  { %v41_v37 = vrot.slane %v40_v29, 2  ;;  %v82_v39 = vmax.f32 %v80_v20, %v81_v31  ;;  %v49_v40 = vmax.f32 %v47_v24, %v48_v32  ;;  %v75_v42 = vmax.f32 %v73_v26, %v74_v34 }
  0x20   :  { %v69_v41 = vrot.slane %v68_v33, 2  ;;  %v56_v44 = vmax.f32 %v54_v28, %v55_v36  ;;  %v62_v46 = vrot.slane %v61_v38, 2  ;;  %v89_v51 = vmax.f32 %v87_v35, %v88_v43 }
  0x21   :  { %v42_v45 = vmax.f32 %v40_v29, %v41_v37  ;;  %v83_v47 = vrot.slane %v82_v39, 2  ;;  %v50_v48 = vrot.slane %v49_v40, 1  ;;  %v76_v50 = vrot.slane %v75_v42, 2 }
  0x22   :  { %v70_v49 = vmax.f32 %v68_v33, %v69_v41  ;;  %v57_v52 = vrot.slane %v56_v44, 1  ;;  %v63_v54 = vmax.f32 %v61_v38, %v62_v46  ;;  %v90_v57 = vrot.slane %v89_v51, 2 }
  0x23   :  { %v43_v53 = vrot.slane %v42_v45, 1  ;;  %v51_v55 = vmax.f32 %v49_v40, %v50_v48  ;;  %v77_v56 = vmax.f32 %v75_v42, %v76_v50  ;;  %v84_v62 = vmax.f32 %v82_v39, %v83_v47 }
  0x24   :  { %v64_v59 = vrot.slane %v63_v54, 1  ;;  %v58_v60 = vmax.f32 %v56_v44, %v57_v52  ;;  %v71_v61 = vrot.slane %v70_v49, 1  ;;  %v91_v1 = vmax.f32 %v89_v51, %v90_v57 }
  0x25   :  { %v44_v58 = vmax.f32 %v42_v45, %v43_v53  ;;  %104 = vrot.lane.b32.xlu0 %v51_v55, %s345_s0  ;;  %v78_v0 = vrot.slane %v77_v56, 1  ;;  %v85_v3 = vrot.slane %v84_v62, 1  ;;  %vm293_vm7 = vcmask 7168  }
  0x26   :  { %v65_v63 = vmax.f32 %v63_v54, %v64_v59  ;;  %v72_v2 = vmax.f32 %v70_v49, %v71_v61  ;;  %v92_v5 = vrot.slane %v91_v1, 1  ;;  %vm295_vm8 = vcmask 15360  }
  0x27   :  { %102 = vrot.lane.b32.xlu1 %v44_v58, %s345_s0  ;;  %v79_v4 = vmax.f32 %v77_v56, %v78_v0  ;;  %v86_v6 = vmax.f32 %v84_v62, %v85_v3  ;;  %vm297_vm9 = vcmask 23552   ;;  %vm299_vm10 = vcmask 31744  }
  0x28   :  { %v93_v7 = vmax.f32 %v91_v1, %v92_v5 }
  0x29   :  { %106 = vrot.lane.b32.xlu0 %v58_v60, %s345_s0 }
  0x2b   :  { %108 = vrot.lane.b32.xlu1 %v65_v63, %s345_s0 }
  0x2d   :  { %110 = vrot.lane.b32.xlu0 %v72_v2, %s345_s0 }
  0x2f   :  { %112 = vrot.lane.b32.xlu1 %v79_v4, %s345_s0 }
  0x31   :  { %114 = vrot.lane.b32.xlu0 %v86_v6, %s345_s0 }
  0x33   :  { %116 = vrot.lane.b32.xlu1 %v93_v7, %s345_s0 }
  0x97   :  { %v105_v8 = vpop.permute.xlu0 %104 }
  0x98   :  { %v127_v9 = vmax.f32 %v51_v55, %v105_v8 }
  0x99   :  { %v103_v10 = vpop.permute.xlu1 %102 }
  0x9a   :  { %144 = vrot.lane.b32.xlu0 %v127_v9, %s346_s24  ;;  %v126_v11 = vmax.f32 %v44_v58, %v103_v10 }
  0x9b   :  { %v107_v12 = vpop.permute.xlu0 %106 }
  0x9c   :  { %v128_v13 = vmax.f32 %v58_v60, %v107_v12 }
  0x9d   :  { %v109_v14 = vpop.permute.xlu1 %108 }
  0x9e   :  { %146 = vrot.lane.b32.xlu1 %v128_v13, %s346_s24  ;;  %142 = vrot.lane.b32.xlu0 %v126_v11, %s346_s24  ;;  %v129_v15 = vmax.f32 %v65_v63, %v109_v14 }
  0x9f   :  { %v111_v16 = vpop.permute.xlu0 %110 }
  0xa0   :  { %v130_v17 = vmax.f32 %v72_v2, %v111_v16 }
  0xa1   :  { %v113_v18 = vpop.permute.xlu1 %112 }
  0xa2   :  { %150 = vrot.lane.b32.xlu0 %v130_v17, %s346_s24  ;;  %148 = vrot.lane.b32.xlu1 %v129_v15, %s346_s24  ;;  %v131_v19 = vmax.f32 %v79_v4, %v113_v18 }
  0xa3   :  { %v115_v20 = vpop.permute.xlu0 %114 }
  0xa4   :  { %v132_v21 = vmax.f32 %v86_v6, %v115_v20 }
  0xa5   :  { %v117_v22 = vpop.permute.xlu1 %116 }
  0xa6   :  { %154 = vrot.lane.b32.xlu0 %v132_v21, %s346_s24  ;;  %152 = vrot.lane.b32.xlu1 %v131_v19, %s346_s24  ;;  %v133_v23 = vmax.f32 %v93_v7, %v117_v22 }
  0xaa   :  { %156 = vrot.lane.b32.xlu1 %v133_v23, %s346_s24 }
 0x10c   :  { %v145_v24 = vpop.permute.xlu0 %144 }
 0x10d   :  { %v167_v25 = vmax.f32 %v127_v9, %v145_v24 }
 0x10f   :  { %184 = vrot.lane.b32.xlu0 %v167_v25, %s347_s25 }
 0x110   :  { %v143_v26 = vpop.permute.xlu0 %142  ;;  %v147_v27 = vpop.permute.xlu1 %146 }
 0x111   :  { %v166_v28 = vmax.f32 %v126_v11, %v143_v26  ;;  %v168_v29 = vmax.f32 %v128_v13, %v147_v27 }
 0x113   :  { %182 = vrot.lane.b32.xlu0 %v166_v28, %s347_s25  ;;  %186 = vrot.lane.b32.xlu1 %v168_v29, %s347_s25 }
 0x114   :  { %v151_v30 = vpop.permute.xlu0 %150  ;;  %v149_v31 = vpop.permute.xlu1 %148 }
 0x115   :  { %v170_v32 = vmax.f32 %v130_v17, %v151_v30  ;;  %v169_v33 = vmax.f32 %v129_v15, %v149_v31 }
 0x117   :  { %190 = vrot.lane.b32.xlu0 %v170_v32, %s347_s25  ;;  %188 = vrot.lane.b32.xlu1 %v169_v33, %s347_s25 }
 0x118   :  { %v155_v34 = vpop.permute.xlu0 %154  ;;  %v153_v35 = vpop.permute.xlu1 %152 }
 0x119   :  { %v172_v36 = vmax.f32 %v132_v21, %v155_v34  ;;  %v171_v37 = vmax.f32 %v131_v19, %v153_v35 }
 0x11b   :  { %194 = vrot.lane.b32.xlu0 %v172_v36, %s347_s25  ;;  %192 = vrot.lane.b32.xlu1 %v171_v37, %s347_s25 }
 0x11c   :  { %v157_v38 = vpop.permute.xlu1 %156 }
 0x11d   :  { %v173_v39 = vmax.f32 %v133_v23, %v157_v38 }
 0x11f   :  { %196 = vrot.lane.b32.xlu1 %v173_v39, %s347_s25 }
 0x181   :  { %v185_v40 = vpop.permute.xlu0 %184 }
 0x182   :  { %v207_v41 = vmax.f32 %v167_v25, %v185_v40 }
 0x184   :  { %224 = vrot.lane.b32.xlu0 %v207_v41, %s348_s26 }
 0x185   :  { %v183_v42 = vpop.permute.xlu0 %182  ;;  %v187_v43 = vpop.permute.xlu1 %186 }
 0x186   :  { %v206_v44 = vmax.f32 %v166_v28, %v183_v42  ;;  %v208_v45 = vmax.f32 %v168_v29, %v187_v43 }
 0x188   :  { %222 = vrot.lane.b32.xlu0 %v206_v44, %s348_s26  ;;  %226 = vrot.lane.b32.xlu1 %v208_v45, %s348_s26 }
 0x189   :  { %v191_v46 = vpop.permute.xlu0 %190  ;;  %v189_v47 = vpop.permute.xlu1 %188 }
 0x18a   :  { %v210_v48 = vmax.f32 %v170_v32, %v191_v46  ;;  %v209_v49 = vmax.f32 %v169_v33, %v189_v47 }
 0x18c   :  { %230 = vrot.lane.b32.xlu0 %v210_v48, %s348_s26  ;;  %228 = vrot.lane.b32.xlu1 %v209_v49, %s348_s26 }
 0x18d   :  { %v195_v50 = vpop.permute.xlu0 %194  ;;  %v193_v51 = vpop.permute.xlu1 %192 }
 0x18e   :  { %v212_v52 = vmax.f32 %v172_v36, %v195_v50  ;;  %v211_v53 = vmax.f32 %v171_v37, %v193_v51 }
 0x190   :  { %234 = vrot.lane.b32.xlu0 %v212_v52, %s348_s26  ;;  %232 = vrot.lane.b32.xlu1 %v211_v53, %s348_s26 }
 0x191   :  { %v197_v54 = vpop.permute.xlu1 %196 }
 0x192   :  { %v213_v55 = vmax.f32 %v173_v39, %v197_v54 }
 0x194   :  { %236 = vrot.lane.b32.xlu1 %v213_v55, %s348_s26 }
 0x1f6   :  { %v225_v56 = vpop.permute.xlu0 %224 }
 0x1f7   :  { %v247_v57 = vmax.f32 %v207_v41, %v225_v56 }
 0x1f9   :  { %v262_v62 = vrot.slane %v247_v57, 7 }
 0x1fa   :  { %v223_v58 = vpop.permute.xlu0 %222  ;;  %v227_v59 = vpop.permute.xlu1 %226 }
 0x1fb   :  { %v246_v60 = vmax.f32 %v206_v44, %v223_v58  ;;  %v248_v61 = vmax.f32 %v208_v45, %v227_v59 }
 0x1fd   :  { %v265_v63 = vrot.slane %v248_v61, 6  ;;  %v264_v2 = vsel %vm263_vm0, %v262_v62, %v246_v60 }
 0x1fe   :  { %v231_v0 = vpop.permute.xlu0 %230  ;;  %v229_v1 = vpop.permute.xlu1 %228 }
 0x1ff   :  { %v250_v3 = vmax.f32 %v210_v48, %v231_v0  ;;  %v249_v4 = vmax.f32 %v209_v49, %v229_v1  ;;  %v267_v6 = vsel %vm266_vm1, %v265_v63, %v264_v2 }
 0x201   :  { %v268_v5 = vrot.slane %v249_v4, 5  ;;  %v271_v7 = vrot.slane %v250_v3, 4 }
 0x202   :  { %v235_v8 = vpop.permute.xlu0 %234  ;;  %v233_v9 = vpop.permute.xlu1 %232 }
 0x203   :  { %v270_v10 = vsel %vm269_vm2, %v268_v5, %v267_v6  ;;  %v252_v11 = vmax.f32 %v212_v52, %v235_v8  ;;  %v251_v12 = vmax.f32 %v211_v53, %v233_v9 }
 0x204   :  { %v273_v15 = vsel %vm272_vm3, %v271_v7, %v270_v10 }
 0x205   :  { %v274_v13 = vrot.slane %v251_v12, 3  ;;  %v277_v14 = vrot.slane %v252_v11, 2 }
 0x206   :  { %v237_v16 = vpop.permute.xlu1 %236 }
 0x207   :  { %v276_v17 = vsel %vm275_vm4, %v274_v13, %v273_v15  ;;  %v253_v18 = vmax.f32 %v213_v55, %v237_v16 }
 0x208   :  { %v279_v20 = vsel %vm278_vm5, %v277_v14, %v276_v17 }
 0x209   :  { %v280_v19 = vrot.slane %v253_v18, 1 }
 0x20b   :  { %v282_v21 = vsel %vm281_vm6, %v280_v19, %v279_v20 }
 0x20c   :  { %287 = vrot.lane.b32.xlu1 %v282_v21, %s349_s27  ;;  %284 = vrot.lane.b32.xlu0 %v282_v21, %s350_s28 }
 0x210   :  { %290 = vrot.lane.b32.xlu0 %v282_v21, %s351_s29 }
 0x27e   :  { %v285_v22 = vpop.permute.xlu0 %284  ;;  %v288_v23 = vpop.permute.xlu1 %287 }
 0x27f   :  { %v294_v24 = vsel %vm293_vm7, %v282_v21, %v285_v22 }
 0x280   :  { %v296_v25 = vsel %vm295_vm8, %v294_v24, %v288_v23 }
 0x282   :  { %v291_v26 = vpop.permute.xlu0 %290 }
 0x283   :  { %v298_v27 = vsel %vm297_vm9, %v296_v25, %v291_v26 }
 0x284   :  { %300 = vst.msk [vmem:[%s381_s1] sm:$0xff] %vm299_vm10, %v298_v27 }
 0x285   :  { %305 = vsyncpa [#allocation3], 1 }

</bundles_post_ra>
